<compile_context>
chip_gen: v7x
topology: tpu7x:2x2x1
jax: 0.10.0
libtpu: 0.0.40
codegen_flags: <defaults>
</compile_context>

<pallas_src>
import math
import numpy as np

import jax
import jax.numpy as jnp
from jax.experimental import pallas as pl
from jax.experimental.pallas import tpu as pltpu

_VMEM_LIMIT = 32 * 1024 * 1024
_NEG = float(np.finfo(np.float32).min)


def _round_up(x, m):
    return ((x + m - 1) // m) * m


# ----------------------------------------------------------------------------------
# Pallas kernel 1: batched 1-nearest-neighbour (torch_cluster.knn with k=1)
# ----------------------------------------------------------------------------------
_KNN_TQ = 128   # query tile  (queries live on lanes)
_KNN_TM = 128   # database tile (db rows on sublanes)


def _knn_kernel(x_ref, xn_ref, xb_ref, qt_ref, qn_ref, qb_ref, out_ref,
                mind_sc, arg_sc):
    di = pl.program_id(1)

    @pl.when(di == 0)
    def _():
        mind_sc[...] = jnp.full_like(mind_sc, jnp.inf)
        arg_sc[...] = jnp.zeros_like(arg_sc)

    x = x_ref[...]                      # [TM, 8]  db coords (lane-padded C -> 8)
    qt = qt_ref[...]                    # [8, TQ]  query coords transposed
    # squared distance via MXU: |x|^2 + |q|^2 - 2 x.q
    d2 = xn_ref[...] + qn_ref[...] - 2.0 * jnp.dot(
        x, qt, preferred_element_type=jnp.float32)           # [TM, TQ]
    same = xb_ref[...] == qb_ref[...]                         # [TM,1]==[1,TQ]
    d2 = jnp.where(same, d2, jnp.inf)

    tile_min = jnp.min(d2, axis=0, keepdims=True)             # [1, TQ]
    row_ids = jax.lax.broadcasted_iota(jnp.int32, d2.shape, 0) + di * d2.shape[0]
    tile_arg = jnp.min(
        jnp.where(d2 == tile_min, row_ids, jnp.iinfo(jnp.int32).max),
        axis=0, keepdims=True)                                # [1, TQ]

    # combine with running accumulator; earlier tiles win ties -> first occurrence.
    better = tile_min < mind_sc[...]
    arg_sc[...] = jnp.where(better, tile_arg, arg_sc[...])
    mind_sc[...] = jnp.minimum(tile_min, mind_sc[...])

    @pl.when(di == pl.num_programs(1) - 1)
    def _():
        out_ref[...] = arg_sc[...]


def knn1(db_coords, q_coords, db_batch, q_batch):
    """Index of the nearest same-batch database point for every query point.
    NOTE: a query with no same-batch database point returns index 0
    (torch_cluster.knn would simply omit the pair)."""
    N, C = q_coords.shape
    M = db_coords.shape[0]
    Np = _round_up(N, _KNN_TQ)
    Mp = _round_up(M, _KNN_TM)

    qf = q_coords.astype(jnp.float32)
    xf = db_coords.astype(jnp.float32)

    qt = jnp.zeros((8, Np), jnp.float32).at[:C, :N].set(qf.T)
    x = jnp.zeros((Mp, 8), jnp.float32).at[:M, :C].set(xf)
    qn = jnp.zeros((1, Np), jnp.float32).at[0, :N].set(jnp.sum(qf * qf, axis=1))
    xn = jnp.zeros((Mp, 1), jnp.float32).at[:M, 0].set(jnp.sum(xf * xf, axis=1))
    qb = jnp.full((1, Np), -1, jnp.int32).at[0, :N].set(q_batch.astype(jnp.int32))
    xb = jnp.full((Mp, 1), -2, jnp.int32).at[:M, 0].set(db_batch.astype(jnp.int32))

    out = pl.pallas_call(
        _knn_kernel,
        grid=(Np // _KNN_TQ, Mp // _KNN_TM),
        in_specs=[
            pl.BlockSpec((_KNN_TM, 8), lambda qi, di: (di, 0)),
            pl.BlockSpec((_KNN_TM, 1), lambda qi, di: (di, 0)),
            pl.BlockSpec((_KNN_TM, 1), lambda qi, di: (di, 0)),
            pl.BlockSpec((8, _KNN_TQ), lambda qi, di: (0, qi)),
            pl.BlockSpec((1, _KNN_TQ), lambda qi, di: (0, qi)),
            pl.BlockSpec((1, _KNN_TQ), lambda qi, di: (0, qi)),
        ],
        out_specs=pl.BlockSpec((1, _KNN_TQ), lambda qi, di: (0, qi)),
        out_shape=jax.ShapeDtypeStruct((1, Np), jnp.int32),
        scratch_shapes=[pltpu.VMEM((1, _KNN_TQ), jnp.float32),
                        pltpu.VMEM((1, _KNN_TQ), jnp.int32)],
        compiler_params=pltpu.CompilerParams(
            dimension_semantics=("parallel", "arbitrary"),
            vmem_limit_bytes=_VMEM_LIMIT),
    )(x, xn, xb, qt, qn, qb)
    return out[0, :N]


# ----------------------------------------------------------------------------------
# Pallas kernel 2: fused sorted segment-max (scatter_max) + Linear + ReLU (pointMLP)
# ----------------------------------------------------------------------------------
_TV = 8      # voxels per output tile (matmul M)
_TN = 128    # sorted point rows per inner pipeline step


def _seg_max_mlp_kernel(rbs_ref, nbt_ref, seg_ref, pf_ref, w_ref, b_ref,
                        out_ref, vmax_ref):
    t = pl.program_id(0)
    j = pl.program_id(1)

    @pl.when(j == 0)
    def _():
        vmax_ref[...] = jnp.full_like(vmax_ref, _NEG)

    # Only process the row blocks actually owned by this voxel tile.
    @pl.when(j < nbt_ref[t])
    def _():
        seg = seg_ref[...]                    # [TN, 1] voxel id per sorted row
        pf = pf_ref[...]                      # [TN, Din]
        neg = jnp.full(pf.shape, _NEG, pf.dtype)
        v0 = t * _TV
        for r in range(_TV):                  # unrolled, _TV == 8
            m = seg == (v0 + r)
            red = jnp.max(jnp.where(m, pf, neg), axis=0, keepdims=True)  # [1, Din]
            cur = vmax_ref[pl.ds(r, 1), :]
            vmax_ref[pl.ds(r, 1), :] = jnp.maximum(cur, red)

    @pl.when(j == pl.num_programs(1) - 1)
    def _():
        y = jnp.dot(vmax_ref[...], w_ref[...], preferred_element_type=jnp.float32)
        out_ref[...] = jnp.maximum(y + b_ref[...], 0.0)


def seg_max_mlp(pf_sorted, seg_sorted, rbs, nbt, num_voxels, w, b, max_blocks):
    """Fused segment-max over voxel-sorted rows followed by Linear + ReLU."""
    Nr, Din = pf_sorted.shape
    Dout = w.shape[1]
    num_tiles = int(rbs.shape[0])
    nb_total = Nr // _TN
    Vp = num_tiles * _TV

    def _row_block(t, j, rbs_r, nbt_r):
        # Clamp skipped iterations (j >= nbt[t]) to the tile's last block so the
        # block index is unchanged between consecutive steps and the DMA is skipped.
        last = rbs_r[t] + jnp.maximum(nbt_r[t] - 1, 0)
        return (jnp.minimum(jnp.minimum(rbs_r[t] + j, last), nb_total - 1), 0)

    grid_spec = pltpu.PrefetchScalarGridSpec(
        num_scalar_prefetch=2,
        grid=(num_tiles, max_blocks),
        in_specs=[
            pl.BlockSpec((_TN, 1), _row_block),
            pl.BlockSpec((_TN, Din), _row_block),
            pl.BlockSpec((Din, Dout), lambda t, j, rbs_r, nbt_r: (0, 0)),  # resident
            pl.BlockSpec((1, Dout), lambda t, j, rbs_r, nbt_r: (0, 0)),
        ],
        out_specs=pl.BlockSpec((_TV, Dout), lambda t, j, rbs_r, nbt_r: (t, 0)),
        scratch_shapes=[pltpu.VMEM((_TV, Din), jnp.float32)],
    )
    out = pl.pallas_call(
        _seg_max_mlp_kernel,
        grid_spec=grid_spec,
        out_shape=jax.ShapeDtypeStruct((Vp, Dout), jnp.float32),
        compiler_params=pltpu.CompilerParams(
            dimension_semantics=("parallel", "arbitrary"),
            vmem_limit_bytes=_VMEM_LIMIT),
    )(rbs, nbt, seg_sorted, pf_sorted, w, b.reshape(1, Dout))
    return out[:num_voxels]


# ----------------------------------------------------------------------------------
# PCRefinement module
# ----------------------------------------------------------------------------------
class PCRefinement:
    def __init__(self, key):
        # pointMLP[i]: Linear(256 + 4*32*2^i -> 4*32*2^i) + ReLU
        dims = [(256 + 4 * 32, 4 * 32), (256 + 8 * 32, 8 * 32), (256 + 16 * 32, 16 * 32)]
        self.params = []
        for i, (din, dout) in enumerate(dims):
            kw, kb = jax.random.split(jax.random.fold_in(key, i))
            bound = 1.0 / math.sqrt(din)
            w = jax.random.uniform(kw, (dout, din), jnp.float32, -bound, bound)
            b = jax.random.uniform(kb, (dout,), jnp.float32, -bound, bound)
            self.params.append((jnp.transpose(w), b))   # store W^T  [din, dout]

    def polar2cube(self, polar_indices, polar_features, point_feat, point,
                   w_t, b, pvox_dim, cvox_dim, batch_size, qinfor):
        pvox_size = (qinfor['cyl_max_extent'] - qinfor['cyl_min_extent']) / pvox_dim
        cvox_size = (qinfor['max_extent'] - qinfor['min_extent']) / cvox_dim

        polar_quantized = jnp.floor((point['p_coord'] - qinfor['cyl_min_extent']) / pvox_size)
        # knn(x=polar.indices[:,1:], y=polar_quantized, k=1, batch_x, batch_y)[1]
        p2p = knn1(polar_indices[:, 1:], polar_quantized,
                   polar_indices[:, 0], point['batch'])

        cube_q = jnp.floor((point['coord'] - qinfor['min_extent']) / cvox_size).astype(jnp.int32)
        cube_q = jnp.concatenate(
            [point['batch'].reshape(-1, 1).astype(jnp.int32), cube_q], axis=1)

        # torch.unique(sorted=True, return_inverse=True, dim=0) + point sort stay on
        # the host (dynamic V); the same step also builds the per-voxel-tile row-block
        # offsets consumed by the fused segment-max/MLP kernel.
        # TODO(synk): replace with a device-side sort+unique (static size bound) to
        # remove the per-level host sync.
        cq_np = np.asarray(cube_q)
        cc_np, inv_np = np.unique(cq_np, axis=0, return_inverse=True)
        inv_np = np.asarray(inv_np).reshape(-1)
        V = int(cc_np.shape[0])
        N = int(cq_np.shape[0])

        order_np = np.argsort(inv_np, kind='stable')
        seg_sorted_np = inv_np[order_np].astype(np.int32)

        num_tiles = (V + _TV - 1) // _TV
        Nr = _round_up(N, _TN)
        tidx = np.arange(num_tiles)
        tile_lo = np.searchsorted(seg_sorted_np, tidx * _TV, side='left')
        tile_hi = np.searchsorted(seg_sorted_np, (tidx + 1) * _TV, side='left')
        rbs_np = (tile_lo // _TN).astype(np.int32)
        rbe_np = np.where(tile_hi > tile_lo, -(-tile_hi // _TN), tile_lo // _TN)
        nbt_np = (rbe_np - rbs_np).astype(np.int32)
        max_blocks = max(int(nbt_np.max()), 1)

        # Gather + concat + sort-permutation in one pass (pf never exists unsorted).
        # TODO(synk): fuse this gather into the kernel via per-row DMA + scalar
        # prefetch to avoid the HBM round trip of pf entirely.
        order = jnp.asarray(order_np, jnp.int32)
        pf_sorted = jnp.concatenate(
            [point_feat[order], polar_features[p2p[order]]], axis=1)
        Din = pf_sorted.shape[1]
        pf_pad = jnp.zeros((Nr, Din), pf_sorted.dtype).at[:N].set(pf_sorted)
        seg_pad = jnp.full((Nr, 1), -1, jnp.int32).at[:N, 0].set(
            jnp.asarray(seg_sorted_np, jnp.int32))

        feat = seg_max_mlp(pf_pad, seg_pad,
                           jnp.asarray(rbs_np, jnp.int32),
                           jnp.asarray(nbt_np, jnp.int32),
                           V, w_t, b, max_blocks)
        center_coord = jnp.asarray(cc_np, jnp.int32)
        return feat, center_coord

    def forward(self, point_feat, point, feats, batch_size, qinfor):
        cyl_voxel_dims = qinfor['cyl_voxel_dims']
        voxel_dims = jnp.asarray([qinfor['voxel_dims']], jnp.float32)   # [1, 3]
        res = []
        for i in range(len(feats)):
            pvox_dim = (cyl_voxel_dims - 1) / 2 ** (i + 1)
            cvox_dim = voxel_dims / 2 ** (i + 1)
            w_t, b = self.params[i]
            feat, cc = self.polar2cube(
                feats[i]['indices'], feats[i]['features'], point_feat, point,
                w_t, b, pvox_dim, cvox_dim, batch_size, qinfor)

            X, Y, Z = [int(round(float(v))) for v in np.asarray(cvox_dim)[0]]
            C = feat.shape[1]
            # Scatter directly into the final [B, C*Z, X, Y] layout (== spconv
            # .dense() -> permute(0,1,4,2,3) -> reshape); channel index = c*Z + z.
            dense = jnp.zeros((batch_size, C * Z, X, Y), feat.dtype)
            ch = jnp.arange(C, dtype=jnp.int32)[None, :] * Z + cc[:, 3][:, None]
            dense = dense.at[cc[:, 0][:, None], ch,
                             cc[:, 1][:, None], cc[:, 2][:, None]].set(feat)
            res.append(dense)
        return res


# ----------------------------------------------------------------------------------
# Demo
# ----------------------------------------------------------------------------------
if __name__ == "__main__":
    key = jax.random.PRNGKey(0)
    B = 2
    N = 64  # number of points

    kfeat, kp, kc, kparam, k0, k1, k2 = jax.random.split(key, 7)

    cyl_min = jnp.array([0.0, 0.0, 0.0], jnp.float32)
    cyl_max = jnp.array([10.0, 6.28, 4.0], jnp.float32)
    xyz_min = jnp.array([-8.0, -8.0, -4.0], jnp.float32)
    xyz_max = jnp.array([8.0, 8.0, 4.0], jnp.float32)

    qinfor = {
        'cyl_voxel_dims': jnp.array([17.0, 17.0, 9.0], jnp.float32),
        'voxel_dims': [16.0, 16.0, 8.0],
        'cyl_min_extent': cyl_min,
        'cyl_max_extent': cyl_max,
        'min_extent': xyz_min,
        'max_extent': xyz_max,
    }

    point_feat = jax.random.normal(kfeat, (N, 256), jnp.float32)
    p_coord = cyl_min + jax.random.uniform(kp, (N, 3), jnp.float32) * (cyl_max - cyl_min) * 0.999
    coord = xyz_min + jax.random.uniform(kc, (N, 3), jnp.float32) * (xyz_max - xyz_min) * 0.999
    batch = jnp.concatenate(
        [jnp.zeros(N // 2, jnp.int32), jnp.ones(N - N // 2, jnp.int32)])
    point = {'p_coord': p_coord, 'coord': coord, 'batch': batch}

    # Polar sparse feature pyramids (feats[i]): indices [M,4]=(batch,i,j,k), features [M,C_i]
    feats = []
    level_keys = [k0, k1, k2]
    Cs = [4 * 32, 8 * 32, 16 * 32]
    M = 32
    cyl_dims = np.array([17.0, 17.0, 9.0])
    for i in range(3):
        pdim = ((cyl_dims - 1) / 2 ** (i + 1)).astype(np.int64)
        rng = np.random.RandomState(i)
        spatial_idx = np.stack(
            [rng.randint(0, int(pdim[d]), size=M) for d in range(3)], axis=1)
        bidx = np.concatenate([np.zeros(M // 2, np.int64), np.ones(M - M // 2, np.int64)])
        indices = jnp.asarray(np.concatenate([bidx[:, None], spatial_idx], axis=1), jnp.int32)
        features = jax.random.normal(level_keys[i], (M, Cs[i]), jnp.float32)
        feats.append({'indices': indices, 'features': features})

    model = PCRefinement(kparam)
    res = model.forward(point_feat, point, feats, B, qinfor)
    expected = [(2, 512, 8, 8), (2, 512, 4, 4), (2, 512, 2, 2)]
    for r, es in zip(res, expected):
        jax.block_until_ready(r)
        assert tuple(r.shape) == es, (r.shape, es)
    print("KERNEL_OK")
</pallas_src>

<mosaic_0001>
module attributes {stable_mosaic.version = 11 : i64} {
  func.func @_knn_kernel(%arg0: i32, %arg1: i32, %arg2: memref<128x8xf32, #tpu.memory_space<vmem>>, %arg3: memref<128x1xf32, #tpu.memory_space<vmem>>, %arg4: memref<128x1xi32, #tpu.memory_space<vmem>>, %arg5: memref<8x128xf32, #tpu.memory_space<vmem>>, %arg6: memref<1x128xf32, #tpu.memory_space<vmem>>, %arg7: memref<1x128xi32, #tpu.memory_space<vmem>>, %arg8: memref<1x128xi32, #tpu.memory_space<vmem>>, %arg9: memref<1x128xf32, #tpu.memory_space<vmem>>, %arg10: memref<1x128xi32, #tpu.memory_space<vmem>>) attributes {dimension_semantics = [#tpu.dimension_semantics<parallel>, #tpu.dimension_semantics<arbitrary>], iteration_bounds = array<i64: 1, 1>, scalar_prefetch = 0 : i64, scratch_operands = 2 : i64, tpu.core_type = #tpu.core_type<tc>, window_params = [{transform_indices = @transform_0, window_bounds = array<i64: 128, 8>}, {transform_indices = @transform_1, window_bounds = array<i64: 128, 1>}, {transform_indices = @transform_2, window_bounds = array<i64: 128, 1>}, {transform_indices = @transform_3, window_bounds = array<i64: 8, 128>}, {transform_indices = @transform_4, window_bounds = array<i64: 1, 128>}, {transform_indices = @transform_5, window_bounds = array<i64: 1, 128>}, {transform_indices = @transform_6, window_bounds = array<i64: 1, 128>}]} {
    %c0_i32 = arith.constant 0 : i32
    %0 = arith.cmpi eq, %arg1, %c0_i32 : i32
    %1 = arith.extui %0 : i1 to i32
    %c0_i32_0 = arith.constant 0 : i32
    %2 = arith.cmpi ne, %1, %c0_i32_0 : i32
    scf.if %2 {
      %cst_28 = arith.constant 0x7F800000 : f32
      %44 = vector.broadcast %cst_28 : f32 to vector<1x128xf32>
      %c0_29 = arith.constant 0 : index
      %c0_30 = arith.constant 0 : index
      %45 = vector.load %arg9[%c0_29, %c0_30] : memref<1x128xf32, #tpu.memory_space<vmem>>, vector<1x128xf32>
      tpu.vector_store %arg9[%c0_29, %c0_30], %44 {strides = array<i32>} : memref<1x128xf32, #tpu.memory_space<vmem>>, vector<1x128xf32>,
      %c0_i32_31 = arith.constant 0 : i32
      %46 = vector.broadcast %c0_i32_31 : i32 to vector<1x128xi32>
      %c0_32 = arith.constant 0 : index
      %c0_33 = arith.constant 0 : index
      %47 = vector.load %arg10[%c0_32, %c0_33] : memref<1x128xi32, #tpu.memory_space<vmem>>, vector<1x128xi32>
      tpu.vector_store %arg10[%c0_32, %c0_33], %46 {strides = array<i32>} : memref<1x128xi32, #tpu.memory_space<vmem>>, vector<1x128xi32>,
    } else {
    }
    %c0 = arith.constant 0 : index
    %c0_1 = arith.constant 0 : index
    %3 = vector.load %arg2[%c0, %c0_1] : memref<128x8xf32, #tpu.memory_space<vmem>>, vector<128x8xf32>
    %c0_2 = arith.constant 0 : index
    %c0_3 = arith.constant 0 : index
    %4 = vector.load %arg5[%c0_2, %c0_3] : memref<8x128xf32, #tpu.memory_space<vmem>>, vector<8x128xf32>
    %c0_4 = arith.constant 0 : index
    %c0_5 = arith.constant 0 : index
    %5 = vector.load %arg3[%c0_4, %c0_5] : memref<128x1xf32, #tpu.memory_space<vmem>>, vector<128x1xf32>
    %c0_6 = arith.constant 0 : index
    %c0_7 = arith.constant 0 : index
    %6 = vector.load %arg6[%c0_6, %c0_7] : memref<1x128xf32, #tpu.memory_space<vmem>>, vector<1x128xf32>
    %7 = vector.broadcast %5 : vector<128x1xf32> to vector<128x128xf32>
    %8 = vector.broadcast %6 : vector<1x128xf32> to vector<128x128xf32>
    %9 = arith.addf %7, %8 : vector<128x128xf32>
    %cst = arith.constant dense<0.000000e+00> : vector<128x128xf32>
    %10 = tpu.matmul %3, %4, %cst {dimension_numbers = #tpu.dot_dimension_numbers<[1], [0], [0], [1], [0, 0, 1, 1], [], []>} : vector<128x8xf32>, vector<8x128xf32>, vector<128x128xf32> -> vector<128x128xf32>
    %cst_8 = arith.constant 2.000000e+00 : f32
    %11 = vector.broadcast %cst_8 : f32 to vector<128x128xf32>
    %12 = arith.mulf %11, %10 : vector<128x128xf32>
    %13 = arith.subf %9, %12 : vector<128x128xf32>
    %c0_9 = arith.constant 0 : index
    %c0_10 = arith.constant 0 : index
    %14 = vector.load %arg4[%c0_9, %c0_10] : memref<128x1xi32, #tpu.memory_space<vmem>>, vector<128x1xi32>
    %c0_11 = arith.constant 0 : index
    %c0_12 = arith.constant 0 : index
    %15 = vector.load %arg7[%c0_11, %c0_12] : memref<1x128xi32, #tpu.memory_space<vmem>>, vector<1x128xi32>
    %16 = vector.broadcast %14 : vector<128x1xi32> to vector<128x128xi32>
    %17 = vector.broadcast %15 : vector<1x128xi32> to vector<128x128xi32>
    %18 = arith.cmpi eq, %16, %17 : vector<128x128xi32>
    %cst_13 = arith.constant 0x7F800000 : f32
    %19 = vector.broadcast %cst_13 : f32 to vector<128x128xf32>
    %20 = arith.select %18, %13, %19 : vector<128x128xi1>, vector<128x128xf32>
    %cst_14 = arith.constant dense<0x7F800000> : vector<128xf32>
    %21 = vector.multi_reduction <minimumf>, %20, %cst_14 [0] : vector<128x128xf32> to vector<128xf32>
    %22 = vector.shape_cast %21 : vector<128xf32> to vector<1x128xf32>
    %23 = tpu.iota {dimensions = array<i32: 0>} : vector<128x128xi32>
    %c128_i32 = arith.constant 128 : i32
    %24 = arith.muli %arg1, %c128_i32 : i32
    %25 = vector.broadcast %24 : i32 to vector<128x128xi32>
    %26 = arith.addi %23, %25 : vector<128x128xi32>
    %27 = vector.broadcast %22 : vector<1x128xf32> to vector<128x128xf32>
    %28 = arith.cmpf oeq, %20, %27 : vector<128x128xf32>
    %c2147483647_i32 = arith.constant 2147483647 : i32
    %29 = vector.broadcast %c2147483647_i32 : i32 to vector<128x128xi32>
    %30 = arith.select %28, %26, %29 : vector<128x128xi1>, vector<128x128xi32>
    %cst_15 = arith.constant dense<2147483647> : vector<128xi32>
    %31 = vector.multi_reduction <minsi>, %30, %cst_15 [0] : vector<128x128xi32> to vector<128xi32>
    %32 = vector.shape_cast %31 : vector<128xi32> to vector<1x128xi32>
    %c0_16 = arith.constant 0 : index
    %c0_17 = arith.constant 0 : index
    %33 = vector.load %arg9[%c0_16, %c0_17] : memref<1x128xf32, #tpu.memory_space<vmem>>, vector<1x128xf32>
    %34 = arith.cmpf olt, %22, %33 : vector<1x128xf32>
    %c0_18 = arith.constant 0 : index
    %c0_19 = arith.constant 0 : index
    %35 = vector.load %arg10[%c0_18, %c0_19] : memref<1x128xi32, #tpu.memory_space<vmem>>, vector<1x128xi32>
    %36 = arith.select %34, %32, %35 : vector<1x128xi1>, vector<1x128xi32>
    %c0_20 = arith.constant 0 : index
    %c0_21 = arith.constant 0 : index
    %37 = vector.load %arg10[%c0_20, %c0_21] : memref<1x128xi32, #tpu.memory_space<vmem>>, vector<1x128xi32>
    tpu.vector_store %arg10[%c0_20, %c0_21], %36 {strides = array<i32>} : memref<1x128xi32, #tpu.memory_space<vmem>>, vector<1x128xi32>,
    %c0_22 = arith.constant 0 : index
    %c0_23 = arith.constant 0 : index
    %38 = vector.load %arg9[%c0_22, %c0_23] : memref<1x128xf32, #tpu.memory_space<vmem>>, vector<1x128xf32>
    %39 = arith.minimumf %22, %38 : vector<1x128xf32>
    %c0_24 = arith.constant 0 : index
    %c0_25 = arith.constant 0 : index
    %40 = vector.load %arg9[%c0_24, %c0_25] : memref<1x128xf32, #tpu.memory_space<vmem>>, vector<1x128xf32>
    tpu.vector_store %arg9[%c0_24, %c0_25], %39 {strides = array<i32>} : memref<1x128xf32, #tpu.memory_space<vmem>>, vector<1x128xf32>,
    %c0_i32_26 = arith.constant 0 : i32
    %41 = arith.cmpi eq, %arg1, %c0_i32_26 : i32
    %42 = arith.extui %41 : i1 to i32
    %c0_i32_27 = arith.constant 0 : i32
    %43 = arith.cmpi ne, %42, %c0_i32_27 : i32
    scf.if %43 {
      %c0_28 = arith.constant 0 : index
      %c0_29 = arith.constant 0 : index
      %44 = vector.load %arg10[%c0_28, %c0_29] : memref<1x128xi32, #tpu.memory_space<vmem>>, vector<1x128xi32>
      %c0_30 = arith.constant 0 : index
      %c0_31 = arith.constant 0 : index
      %45 = vector.load %arg8[%c0_30, %c0_31] : memref<1x128xi32, #tpu.memory_space<vmem>>, vector<1x128xi32>
      tpu.vector_store %arg8[%c0_30, %c0_31], %44 {strides = array<i32>} : memref<1x128xi32, #tpu.memory_space<vmem>>, vector<1x128xi32>,
    } else {
    }
    return
  }
  func.func @transform_0(%arg0: i32, %arg1: i32) -> (i32, i32) {
    %c0_i32 = arith.constant 0 : i32
    %c0_i32_0 = arith.constant 0 : i32
    return %arg1, %c0_i32 : i32, i32
  }
  func.func @transform_1(%arg0: i32, %arg1: i32) -> (i32, i32) {
    %c0_i32 = arith.constant 0 : i32
    %c0_i32_0 = arith.constant 0 : i32
    return %arg1, %c0_i32 : i32, i32
  }
  func.func @transform_2(%arg0: i32, %arg1: i32) -> (i32, i32) {
    %c0_i32 = arith.constant 0 : i32
    %c0_i32_0 = arith.constant 0 : i32
    return %arg1, %c0_i32 : i32, i32
  }
  func.func @transform_3(%arg0: i32, %arg1: i32) -> (i32, i32) {
    %c0_i32 = arith.constant 0 : i32
    %c0_i32_0 = arith.constant 0 : i32
    return %c0_i32, %arg0 : i32, i32
  }
  func.func @transform_4(%arg0: i32, %arg1: i32) -> (i32, i32) {
    %c0_i32 = arith.constant 0 : i32
    %c0_i32_0 = arith.constant 0 : i32
    return %c0_i32, %arg0 : i32, i32
  }
  func.func @transform_5(%arg0: i32, %arg1: i32) -> (i32, i32) {
    %c0_i32 = arith.constant 0 : i32
    %c0_i32_0 = arith.constant 0 : i32
    return %c0_i32, %arg0 : i32, i32
  }
  func.func @transform_6(%arg0: i32, %arg1: i32) -> (i32, i32) {
    %c0_i32 = arith.constant 0 : i32
    %c0_i32_0 = arith.constant 0 : i32
    return %c0_i32, %arg0 : i32, i32
  }
}

</mosaic_0001>

<bundles_post_ra>
// kernel: tpu_custom_call.1
= control target key start
LH: loop header
LB: loop body
LE: loop exit
PB: predicated region body
PF: predicated region fallthrough
CT: control target
= control target key end

     0   :  { %v739_v1 = vmov 0   ;;  %vm166_vm0 = vcmask 64512   ;;  %s1215_s0 = inlined_call_operand.vmem [shape: f32[128,8], index: 0, kind: input, shape index: {}]   ;;  %s1216_s1 = inlined_call_operand.vmem [shape: f32[128,1], index: 1, kind: input, shape index: {}]   ;;  %s1217_s2 = inlined_call_operand.vmem [shape: s32[128,1], index: 2, kind: input, shape index: {}]   ;;  %s1218_s3 = inlined_call_operand.vmem [shape: f32[8,128], index: 3, kind: input, shape index: {}]   ;;  %s1219_s4 = inlined_call_operand.vmem [shape: f32[1,128], index: 4, kind: input, shape index: {}]   ;;  %s1220_s5 = inlined_call_operand.vmem [shape: s32[1,128], index: 5, kind: input, shape index: {}]   ;;  %s1221_s6 = inlined_call_operand.hbm [shape: s32[1,128], index: 6, kind: output, shape index: {}]  }
   0x1   :  { %v46_v0 = vld [vmem:[%s1218_s3] sm:$0xff]  ;;  %29 = vst [vmem:[#allocation3] sm:$0x1] %v739_v1  ;;  %714 = vset.pattern.permute.xlu1 %v739_v1  ;;  %713 = vset.pattern.permute.xlu0 %v739_v1  ;;  %v49_v4 = vld [vmem:[%s1216_s1 + $0x10] sm:$0xff]  ;;  %v31_v6 = vld [vmem:[%s1215_s0 + $0x8] sm:$0xff] }
   0x2   :  { %682 = vmatprep.subr.mxu0 %v46_v0  ;;  %708 = vmatprep.subr.mxu1 %v46_v0  ;;  %v30_v2 = vld [vmem:[%s1215_s0] sm:$0xff]  ;;  %v39_v7 = vld [vmem:[%s1215_s0 + $0x48] sm:$0xff]  ;;  %v32_v8 = vld [vmem:[%s1215_s0 + $0x10] sm:$0xff] }
   0x3   :  { %v38_v3 = vld [vmem:[%s1215_s0 + $0x40] sm:$0xff]  ;;  %683 = vmatpush3.msra.mxu0 %v46_v0  ;;  %709 = vmatpush3.msra.mxu1 %v46_v0  ;;  %v40_v9 = vld [vmem:[%s1215_s0 + $0x50] sm:$0xff]  ;;  %v50_v10 = vld [vmem:[%s1216_s1 + $0x18] sm:$0xff] }
   0x4   :  { %v47_v5 = vld [vmem:[%s1216_s1] sm:$0xff]  ;;  %684 = vmatprep.mubr.msk.f32.mxu0 %vm166_vm0, %v30_v2  ;;  %696 = vmatprep.mubr.msk.f32.mxu1 %vm166_vm0, %v38_v3  ;;  %v48_v11 = vld [vmem:[%s1216_s1 + $0x8] sm:$0xff]  ;;  %v33_v12 = vld [vmem:[%s1215_s0 + $0x18] sm:$0xff] }
   0x5   :  { %76 = vperm.xlu1 %714, %v49_v4   ;;  %66 = vperm.xlu0 %713, %v47_v5   ;;  %v41_v13 = vld [vmem:[%s1215_s0 + $0x58] sm:$0xff]  ;;  %v34_v14 = vld [vmem:[%s1215_s0 + $0x20] sm:$0xff]  ;;  %v52_v16 = vld [vmem:[%s1216_s1 + $0x28] sm:$0xff] }
   0x6   :  { %685 = vmatmul.mubr.msk.f32.vlgmr.msra.gmra.mrb[0].mxu0 %vm166_vm0, %v31_v6  ;;  %697 = vmatmul.mubr.msk.f32.vlgmr.msra.gmra.mrb[0].mxu1 %vm166_vm0, %v39_v7  ;;  %v42_v15 = vld [vmem:[%s1215_s0 + $0x60] sm:$0xff]  ;;  %v35_v18 = vld [vmem:[%s1215_s0 + $0x28] sm:$0xff]  ;;  %v36_v20 = vld [vmem:[%s1215_s0 + $0x30] sm:$0xff] }
   0x7   :  { %687 = vmatprep.mubr.msk.f32.mxu0 %vm166_vm0, %v32_v8  ;;  %699 = vmatprep.mubr.msk.f32.mxu1 %vm166_vm0, %v40_v9  ;;  %v51_v17 = vld [vmem:[%s1216_s1 + $0x20] sm:$0xff]  ;;  %v43_v19 = vld [vmem:[%s1215_s0 + $0x68] sm:$0xff]  ;;  %v44_v21 = vld [vmem:[%s1215_s0 + $0x70] sm:$0xff] }
   0x8   :  { %v54_v22 = vld [vmem:[%s1216_s1 + $0x38] sm:$0xff]  ;;  %v53_v23 = vld [vmem:[%s1216_s1 + $0x30] sm:$0xff] }
   0x9   :  { %81 = vperm.xlu1 %714, %v50_v10   ;;  %71 = vperm.xlu0 %713, %v48_v11   ;;  %v37_v24 = vld [vmem:[%s1215_s0 + $0x38] sm:$0xff] }
   0xa   :  { %688 = vmatmul.mubr.msk.f32.gmra.mrb[2].mxu0 %vm166_vm0, %v33_v12  ;;  %700 = vmatmul.mubr.msk.f32.gmra.mrb[2].mxu1 %vm166_vm0, %v41_v13  ;;  %v45_v25 = vld [vmem:[%s1215_s0 + $0x78] sm:$0xff] }
   0xb   :  { %690 = vmatprep.mubr.msk.f32.mxu0 %vm166_vm0, %v34_v14  ;;  %702 = vmatprep.mubr.msk.f32.mxu1 %vm166_vm0, %v42_v15 }
   0xd   :  { %91 = vperm.xlu1 %714, %v52_v16   ;;  %86 = vperm.xlu0 %713, %v51_v17  }
   0xe   :  { %691 = vmatmul.mubr.msk.f32.gmra.mrb[4].mxu0 %vm166_vm0, %v35_v18  ;;  %703 = vmatmul.mubr.msk.f32.gmra.mrb[4].mxu1 %vm166_vm0, %v43_v19 }
   0xf   :  { %693 = vmatprep.mubr.msk.f32.mxu0 %vm166_vm0, %v36_v20  ;;  %705 = vmatprep.mubr.msk.f32.mxu1 %vm166_vm0, %v44_v21 }
  0x10   :  { %11 = vsyncpa [#allocation5], 0  ;;  %v56_v26 = vld [vmem:[%s1216_s1 + $0x48] sm:$0xff]  ;;  %v55_v27 = vld [vmem:[%s1216_s1 + $0x40] sm:$0xff]  ;;  %v740_v50 = vmov inf  }
  0x11   :  { %101 = vperm.xlu1 %714, %v54_v22   ;;  %96 = vperm.xlu0 %713, %v53_v23   ;;  %v58_v28 = vld [vmem:[%s1216_s1 + $0x58] sm:$0xff]  ;;  %v57_v29 = vld [vmem:[%s1216_s1 + $0x50] sm:$0xff]  ;;  %v393_v30 = vld [vmem:[%s1217_s2 + $0x8] sm:$0xff]  ;;  %28 = vst [vmem:[#allocation2] sm:$0x1] %v740_v50 }
  0x12   :  { %694 = vmatmul.mubr.msk.f32.gmra.mrb[6].mxu0 %vm166_vm0, %v37_v24  ;;  %706 = vmatmul.mubr.msk.f32.gmra.mrb[6].mxu1 %vm166_vm0, %v45_v25  ;;  %v392_v31 = vld [vmem:[%s1217_s2] sm:$0xff]  ;;  %v395_v32 = vld [vmem:[%s1217_s2 + $0x18] sm:$0xff]  ;;  %v394_v33 = vld [vmem:[%s1217_s2 + $0x10] sm:$0xff] }
  0x13   :  { %v397_v34 = vld [vmem:[%s1217_s2 + $0x28] sm:$0xff]  ;;  %v396_v35 = vld [vmem:[%s1217_s2 + $0x20] sm:$0xff]  ;;  %v399_v36 = vld [vmem:[%s1217_s2 + $0x38] sm:$0xff] }
  0x14   :  { %v398_v37 = vld [vmem:[%s1217_s2 + $0x30] sm:$0xff]  ;;  %v60_v38 = vld [vmem:[%s1216_s1 + $0x68] sm:$0xff]  ;;  %v59_v39 = vld [vmem:[%s1216_s1 + $0x60] sm:$0xff] }
  0x15   :  { %111 = vperm.xlu1 %714, %v56_v26   ;;  %106 = vperm.xlu0 %713, %v55_v27   ;;  %v62_v40 = vld [vmem:[%s1216_s1 + $0x78] sm:$0xff]  ;;  %v61_v41 = vld [vmem:[%s1216_s1 + $0x70] sm:$0xff]  ;;  %v401_v42 = vld [vmem:[%s1217_s2 + $0x48] sm:$0xff] }
  0x16   :  { %v400_v43 = vld [vmem:[%s1217_s2 + $0x40] sm:$0xff]  ;;  %v403_v44 = vld [vmem:[%s1217_s2 + $0x58] sm:$0xff]  ;;  %v402_v45 = vld [vmem:[%s1217_s2 + $0x50] sm:$0xff] }
  0x17   :  { %v405_v46 = vld [vmem:[%s1217_s2 + $0x68] sm:$0xff]  ;;  %v404_v47 = vld [vmem:[%s1217_s2 + $0x60] sm:$0xff]  ;;  %v407_v48 = vld [vmem:[%s1217_s2 + $0x78] sm:$0xff] }
  0x18   :  { %v406_v49 = vld [vmem:[%s1217_s2 + $0x70] sm:$0xff]  ;;  %v647_v13 = vld [vmem:[%s1219_s4] ss:$0 sm:$0xff]  ;;  %s741_s4 = smov [#allocation4]  }
  0x19   :  { %121 = vperm.xlu1 %714, %v58_v28   ;;  %116 = vperm.xlu0 %713, %v57_v29   ;;  %v976_v23 = vld [vmem:[%s1220_s5] ss:$0 sm:$0xff]  ;;  %s639_s5 = sshll.u32 %s741_s4, 4  ;;  %s640_s5 = int_to_ptr.vmem [resolvable:$true] %s639_s5 }
  0x1a   :  { %s715_s19 = scalar_lea.vmem %s640_s5, 16  ;;  %s719_s20 = scalar_lea.vmem %s640_s5, 32 }
  0x1b   :  { %p716_p0 = scmp.ne.s32.totalorder %s640_s5, %s715_s19  ;;  %p720_p1 = scmp.lt.s32.totalorder %s640_s5, %s640_s5 }
  0x1c   :  { %p721_p2 = scmp.lt.s32.totalorder %s719_s20, %s715_s19 }
  0x1d   :  { %413 = vperm.xlu1 %714, %v393_v30   ;;  %410 = vperm.xlu0 %713, %v392_v31  }
  0x1e   :  { %p722_p3 = por %p721_p2, %p720_p1 }
  0x20   :  { %p723_p4 = pnand %p722_p3, %p716_p0 }
  0x21   :  { %419 = vperm.xlu1 %714, %v395_v32   ;;  %416 = vperm.xlu0 %713, %v394_v33  }
  0x25   :  { %425 = vperm.xlu1 %714, %v397_v34   ;;  %422 = vperm.xlu0 %713, %v396_v35  }
  0x29   :  { %431 = vperm.xlu1 %714, %v399_v36   ;;  %428 = vperm.xlu0 %713, %v398_v37  }
  0x2d   :  { %131 = vperm.xlu1 %714, %v60_v38   ;;  %126 = vperm.xlu0 %713, %v59_v39  }
  0x31   :  { %141 = vperm.xlu1 %714, %v62_v40   ;;  %136 = vperm.xlu0 %713, %v61_v41  }
  0x35   :  { %437 = vperm.xlu1 %714, %v401_v42   ;;  %434 = vperm.xlu0 %713, %v400_v43  }
  0x39   :  { %443 = vperm.xlu1 %714, %v403_v44   ;;  %440 = vperm.xlu0 %713, %v402_v45  }
  0x3d   :  { %449 = vperm.xlu1 %714, %v405_v46   ;;  %446 = vperm.xlu0 %713, %v404_v47  }
  0x41   :  { %455 = vperm.xlu1 %714, %v407_v48   ;;  %452 = vperm.xlu0 %713, %v406_v49  }
  0x84   :  { %v77_v51 = vpop.permute.xlu1 %76  ;;  %v67_v52 = vpop.permute.xlu0 %66 }
  0x85   :  { %v967_v16 = vadd.f32 %v647_v13, %v77_v51  ;;  %v150_v17 = vadd.f32 %v647_v13, %v67_v52 }
  0x88   :  { %v82_v53 = vpop.permute.xlu1 %81  ;;  %v72_v54 = vpop.permute.xlu0 %71 }
  0x89   :  { %v969_v20 = vadd.f32 %v647_v13, %v82_v53  ;;  %v151_v21 = vadd.f32 %v647_v13, %v72_v54 }
  0x8c   :  { %v92_v55 = vpop.permute.xlu1 %91  ;;  %v87_v56 = vpop.permute.xlu0 %86 }
  0x8d   :  { %v971_v22 = vadd.f32 %v647_v13, %v92_v55  ;;  %v978_v27 = vadd.f32 %v647_v13, %v87_v56 }
  0x90   :  { %v102_v57 = vpop.permute.xlu1 %101  ;;  %v97_v58 = vpop.permute.xlu0 %96 }
  0x91   :  { %v980_v28 = vadd.f32 %v647_v13, %v102_v57  ;;  %v982_v29 = vadd.f32 %v647_v13, %v97_v58 }
  0x94   :  { %v112_v59 = vpop.permute.xlu1 %111  ;;  %v107_v60 = vpop.permute.xlu0 %106 }
  0x95   :  { %v159_v31 = vadd.f32 %v647_v13, %v112_v59  ;;  %v158_v32 = vadd.f32 %v647_v13, %v107_v60 }
  0x98   :  { %v122_v61 = vpop.permute.xlu1 %121  ;;  %v117_v62 = vpop.permute.xlu0 %116 }
  0x99   :  { %v986_v36 = vadd.f32 %v647_v13, %v122_v61  ;;  %v988_v37 = vadd.f32 %v647_v13, %v117_v62 }
  0x9c   :  { %v940_v63 = vpop.permute.xlu1 %413  ;;  %v942_v0 = vpop.permute.xlu0 %410 }
  0x9d   :  { %vm462_vm1 = vcmp.eq.s32.totalorder %v940_v63, %v976_v23  ;;  %vm461_vm2 = vcmp.eq.s32.totalorder %v942_v0, %v976_v23 }
  0xa0   :  { %v944_v1 = vpop.permute.xlu1 %419  ;;  %v946_v2 = vpop.permute.xlu0 %416 }
  0xa1   :  { %vm464_vm5 = vcmp.eq.s32.totalorder %v944_v1, %v976_v23  ;;  %vm463_vm6 = vcmp.eq.s32.totalorder %v946_v2, %v976_v23 }
  0xa4   :  { %v948_v3 = vpop.permute.xlu1 %425  ;;  %v950_v4 = vpop.permute.xlu0 %422 }
  0xa5   :  { %vm466_vm3 = vcmp.eq.s32.totalorder %v948_v3, %v976_v23  ;;  %vm465_vm4 = vcmp.eq.s32.totalorder %v950_v4, %v976_v23 }
  0xa8   :  { %v952_v5 = vpop.permute.xlu1 %431  ;;  %v954_v6 = vpop.permute.xlu0 %428 }
  0xa9   :  { %vm468_vm8 = vcmp.eq.s32.totalorder %v952_v5, %v976_v23  ;;  %vm467_vm11 = vcmp.eq.s32.totalorder %v954_v6, %v976_v23 }
  0xac   :  { %v132_v7 = vpop.permute.xlu1 %131  ;;  %v127_v8 = vpop.permute.xlu0 %126 }
  0xad   :  { %v163_v40 = vadd.f32 %v647_v13, %v132_v7  ;;  %v162_v44 = vadd.f32 %v647_v13, %v127_v8 }
  0xb0   :  { %v142_v9 = vpop.permute.xlu1 %141  ;;  %v137_v10 = vpop.permute.xlu0 %136 }
  0xb1   :  { %v1000_v45 = vadd.f32 %v647_v13, %v142_v9  ;;  %v1002_v46 = vadd.f32 %v647_v13, %v137_v10 }
  0xb4   :  { %v956_v11 = vpop.permute.xlu1 %437  ;;  %v958_v12 = vpop.permute.xlu0 %434 }
  0xb5   :  { %vm470_vm7 = vcmp.eq.s32.totalorder %v956_v11, %v976_v23  ;;  %vm469_vm9 = vcmp.eq.s32.totalorder %v958_v12, %v976_v23 }
  0xb8   :  { %v963_v14 = vpop.permute.xlu1 %443  ;;  %v965_v15 = vpop.permute.xlu0 %440 }
  0xb9   :  { %vm472_vm13 = vcmp.eq.s32.totalorder %v963_v14, %v976_v23  ;;  %vm471_vm14 = vcmp.eq.s32.totalorder %v965_v15, %v976_v23 }
  0xbc   :  { %v984_v33 = vpop.permute.xlu1 %449  ;;  %v447_v47 = vpop.permute.xlu0 %446 }
  0xbd   :  { %vm474_vm10 = vcmp.eq.s32.totalorder %v984_v33, %v976_v23  ;;  %vm473_vm12 = vcmp.eq.s32.totalorder %v447_v47, %v976_v23 }
  0xd9   :  { %v686_v18 = vpop.f32.mrb[0].mxu0  ;;  %v698_v19 = vpop.f32.mrb[0].mxu1 }
  0xda   :  { %v361_v24 = vmul.f32 2.0, %v686_v18  ;;  %v281_v25 = vpop.f32.mrb[1].mxu0  ;;  %v321_v26 = vpop.f32.mrb[1].mxu1  ;;  %v369_v30 = vmul.f32 2.0, %v698_v19 }
  0xdb   :  { %v360_v34 = vmul.f32 2.0, %v281_v25  ;;  %v368_v35 = vmul.f32 2.0, %v321_v26 }
  0xdc   :  { %v377_v41 = vsub.f32 %v151_v21, %v361_v24  ;;  %v385_v48 = vsub.f32 %v159_v31, %v369_v30 }
  0xdd   :  { %v689_v38 = vpop.f32.mrb[2].mxu0  ;;  %v701_v39 = vpop.f32.mrb[2].mxu1  ;;  %v376_v49 = vsub.f32 %v150_v17, %v360_v34  ;;  %v384_v50 = vsub.f32 %v158_v32, %v368_v35 }
  0xde   :  { %v291_v42 = vpop.f32.mrb[3].mxu0  ;;  %v331_v43 = vpop.f32.mrb[3].mxu1  ;;  %v363_v51 = vmul.f32 2.0, %v689_v38  ;;  %v371_v52 = vmul.f32 2.0, %v701_v39  ;;  %v1020_v56 = vsel %vm462_vm1, %v377_v41, inf  ;;  %v1027_v61 = vsel %vm470_vm7, %v385_v48, inf }
  0xdf   :  { %v362_v53 = vmul.f32 2.0, %v291_v42  ;;  %v370_v62 = vmul.f32 2.0, %v331_v43  ;;  %v1032_v63 = vsel %vm461_vm2, %v376_v49, inf  ;;  %v1037_v9 = vsel %vm469_vm9, %v384_v50, inf  ;;  %v456_v38 = vpop.permute.xlu1 %455 }
  0xe0   :  { %v379_v10 = vsub.f32 %v969_v20, %v363_v51  ;;  %v387_v11 = vsub.f32 %v986_v36, %v371_v52  ;;  %vm476_vm15 = vcmp.eq.s32.totalorder %v456_v38, %v976_v23 }
  0xe1   :  { %v692_v54 = vpop.f32.mrb[4].mxu0  ;;  %v704_v55 = vpop.f32.mrb[4].mxu1  ;;  %v378_v17 = vsub.f32 %v967_v16, %v362_v53  ;;  %v514_v53 = vlaneseq }
  0xe2   :  { %v365_v57 = vmul.f32 2.0, %v692_v54  ;;  %v373_v58 = vmul.f32 2.0, %v704_v55  ;;  %v301_v59 = vpop.f32.mrb[5].mxu0  ;;  %v341_v60 = vpop.f32.mrb[5].mxu1  ;;  %v1060_v3 = vsel %vm464_vm5, %v379_v10, inf  ;;  %v1102_v5 = vsel %vm472_vm13, %v387_v11, inf }
  0xe3   :  { %v364_v7 = vmul.f32 2.0, %v301_v59  ;;  %v372_v8 = vmul.f32 2.0, %v341_v60  ;;  %v1068_v36 = vsel %vm463_vm6, %v378_v17, inf }
  0xe4   :  { %v381_v13 = vsub.f32 %v971_v22, %v365_v57  ;;  %v389_v18 = vsub.f32 %v163_v40, %v373_v58  ;;  %v386_v22 = vsub.f32 %v988_v37, %v370_v62  ;;  %v453_v40 = vpop.permute.xlu0 %452  ;;  %v515_v57 = vshrl.u32 %v514_v53, 7 }
  0xe5   :  { %v380_v19 = vsub.f32 %v978_v27, %v364_v7  ;;  %v695_v21 = vpop.f32.mrb[6].mxu0  ;;  %v707_v0 = vpop.f32.mrb[6].mxu1  ;;  %v388_v12 = vsub.f32 %v162_v44, %v372_v8  ;;  %vm475_vm0 = vcmp.eq.s32.totalorder %v453_v40, %v976_v23 }
  0xe6   :  { %v1047_v24 = vsel %vm466_vm3, %v381_v13, inf  ;;  %v367_v25 = vmul.f32 2.0, %v695_v21  ;;  %v375_v26 = vmul.f32 2.0, %v707_v0  ;;  %v311_v20 = vpop.f32.mrb[7].mxu0  ;;  %v351_v30 = vpop.f32.mrb[7].mxu1  ;;  %v1073_v4 = vsel %vm474_vm10, %v389_v18, inf }
  0xe7   :  { %v494_v16 = vmin.f32 %v1020_v56, %v1047_v24  ;;  %v1055_v27 = vsel %vm465_vm4, %v380_v19, inf  ;;  %v366_v31 = vmul.f32 2.0, %v311_v20  ;;  %v374_v35 = vmul.f32 2.0, %v351_v30  ;;  %v625_v30 = vld [vmem:[#allocation2] sm:$0x1] }
  0xe8   :  { %v493_v32 = vmin.f32 %v1032_v63, %v1055_v27  ;;  %v383_v34 = vsub.f32 %v980_v28, %v367_v25  ;;  %v1079_v39 = vsel %vm473_vm12, %v388_v12, inf  ;;  %v391_v33 = vsub.f32 %v1000_v45, %v375_v26 }
  0xe9   :  { %v498_v1 = vmin.f32 %v494_v16, %v1027_v61  ;;  %v382_v37 = vsub.f32 %v982_v29, %v366_v31  ;;  %v390_v43 = vsub.f32 %v1002_v46, %v374_v35  ;;  %v1108_v6 = vsel %vm471_vm14, %v386_v22, inf }
  0xea   :  { %v497_v28 = vmin.f32 %v493_v32, %v1037_v9  ;;  %v1085_v2 = vsel %vm468_vm8, %v383_v34, inf  ;;  %v1112_v15 = vsel %vm476_vm15, %v391_v33, inf  ;;  %v516_v23 = vadd.s32 8, %v515_v57  ;;  %v620_v32 = vld [vmem:[#allocation2] sm:$0x1] }
  0xeb   :  { %v502_v41 = vmin.f32 %v498_v1, %v1073_v4  ;;  %v496_v29 = vmin.f32 %v1060_v3, %v1085_v2  ;;  %v1094_v42 = vsel %vm467_vm11, %v382_v37, inf  ;;  %v1116_v49 = vsel %vm475_vm0, %v390_v43, inf }
  0xec   :  { %v501_v44 = vmin.f32 %v497_v28, %v1079_v39  ;;  %v495_v45 = vmin.f32 %v1068_v36, %v1094_v42  ;;  %v517_v62 = vadd.s32 16, %v515_v57  ;;  %v518_v7 = vadd.s32 24, %v515_v57 }
  0xed   :  { %v500_v47 = vmin.f32 %v496_v29, %v1102_v5  ;;  %v519_v8 = vadd.s32 32, %v515_v57  ;;  %v520_v10 = vadd.s32 40, %v515_v57  ;;  %v521_v13 = vadd.s32 48, %v515_v57 }
  0xee   :  { %v505_v46 = vmin.f32 %v501_v44, %v502_v41  ;;  %v499_v14 = vmin.f32 %v495_v45, %v1108_v6  ;;  %v522_v11 = vadd.s32 56, %v515_v57  ;;  %v523_v17 = vadd.s32 64, %v515_v57 }
  0xef   :  { %v504_v48 = vmin.f32 %v500_v47, %v1112_v15  ;;  %v524_v19 = vadd.s32 72, %v515_v57  ;;  %v525_v21 = vadd.s32 80, %v515_v57  ;;  %v526_v0 = vadd.s32 88, %v515_v57 }
  0xf0   :  { %v503_v50 = vmin.f32 %v499_v14, %v1116_v49  ;;  %v527_v12 = vadd.s32 96, %v515_v57  ;;  %v528_v25 = vadd.s32 104, %v515_v57  ;;  %v529_v26 = vadd.s32 112, %v515_v57 }
  0xf1   :  { %v530_v20 = vadd.s32 120, %v515_v57 }
  0xf2   :  { %v506_v51 = vmin.f32 %v503_v50, %v504_v48 }
  0xf4   :  { %v507_v52 = vmin.f32 %v505_v46, %v506_v51  ;;  %v622_v51 = vld [vmem:[#allocation3] sm:$0x1] }
  0xf6   :  { %v508_v54 = vrot.slane %v507_v52, 4 }
  0xf8   :  { %v509_v55 = vmin.f32 %v507_v52, %v508_v54 }
  0xfa   :  { %v510_v58 = vrot.slane %v509_v55, 2 }
  0xfc   :  { %v511_v59 = vmin.f32 %v509_v55, %v510_v58 }
  0xfe   :  { %v512_v60 = vrot.slane %v511_v59, 1 }
 0x100   :  { %v1119_v18 = vmin.f32 %v511_v59, %v512_v60 }
 0x102   :  { %vm549_vm1 = vcmp.eq.f32.partialorder %v1032_v63, %v1119_v18  ;;  %vm550_vm2 = vcmp.eq.f32.partialorder %v1020_v56, %v1119_v18  ;;  %vm551_vm3 = vcmp.eq.f32.partialorder %v1068_v36, %v1119_v18  ;;  %vm552_vm4 = vcmp.eq.f32.partialorder %v1060_v3, %v1119_v18 }
 0x103   :  { %vm553_vm5 = vcmp.eq.f32.partialorder %v1055_v27, %v1119_v18  ;;  %vm554_vm6 = vcmp.eq.f32.partialorder %v1047_v24, %v1119_v18  ;;  %vm555_vm7 = vcmp.eq.f32.partialorder %v1094_v42, %v1119_v18  ;;  %vm556_vm8 = vcmp.eq.f32.partialorder %v1085_v2, %v1119_v18 }
 0x104   :  { %vm557_vm9 = vcmp.eq.f32.partialorder %v1037_v9, %v1119_v18  ;;  %vm558_vm10 = vcmp.eq.f32.partialorder %v1027_v61, %v1119_v18  ;;  %vm559_vm11 = vcmp.eq.f32.partialorder %v1108_v6, %v1119_v18  ;;  %vm560_vm12 = vcmp.eq.f32.partialorder %v1102_v5, %v1119_v18 }
 0x105   :  { %vm561_vm13 = vcmp.eq.f32.partialorder %v1079_v39, %v1119_v18  ;;  %vm562_vm14 = vcmp.eq.f32.partialorder %v1073_v4, %v1119_v18  ;;  %vm563_vm15 = vcmp.eq.f32.partialorder %v1116_v49, %v1119_v18  ;;  %vm564_vm0 = vcmp.eq.f32.partialorder %v1112_v15, %v1119_v18 }
 0x106   :  { %v565_v22 = vsel %vm549_vm1, %v515_v57, 2147483647  ;;  %v566_v16 = vsel %vm550_vm2, %v516_v23, 2147483647  ;;  %v567_v31 = vsel %vm551_vm3, %v517_v62, 2147483647  ;;  %v626_v56 = vmin.f32 %v1119_v18, %v625_v30 }
 0x107   :  { %v568_v34 = vsel %vm552_vm4, %v518_v7, 2147483647  ;;  %v569_v35 = vsel %vm553_vm5, %v519_v8, 2147483647  ;;  %v570_v63 = vsel %vm554_vm6, %v520_v10, 2147483647 }
 0x108   :  { %v571_v36 = vsel %vm555_vm7, %v521_v13, 2147483647  ;;  %v572_v1 = vsel %vm556_vm8, %v522_v11, 2147483647  ;;  %v573_v3 = vsel %vm557_vm9, %v523_v17, 2147483647  ;;  %vm581_vm1 = vcmp.lt.s32.totalorder %v565_v22, %v569_v35 }
 0x109   :  { %v574_v24 = vsel %vm558_vm10, %v524_v19, 2147483647  ;;  %v575_v27 = vsel %vm559_vm11, %v525_v21, 2147483647  ;;  %v576_v37 = vsel %vm560_vm12, %v526_v0, 2147483647  ;;  %v582_v38 = vsel %vm581_vm1, %v565_v22, %v569_v35 }
 0x10a   :  { %627 = vst [vmem:[#allocation2] sm:$0x1] %v626_v56  ;;  %v577_v9 = vsel %vm561_vm13, %v527_v12, 2147483647  ;;  %v578_v28 = vsel %vm562_vm14, %v528_v25, 2147483647  ;;  %vm583_vm2 = vcmp.lt.s32.totalorder %v566_v16, %v570_v63  ;;  %vm585_vm3 = vcmp.lt.s32.totalorder %v567_v31, %v571_v36 }
 0x10b   :  { %v579_v61 = vsel %vm563_vm15, %v529_v26, 2147483647  ;;  %v580_v2 = vsel %vm564_vm0, %v530_v20, 2147483647  ;;  %v584_v33 = vsel %vm583_vm2, %v566_v16, %v570_v63  ;;  %vm587_vm4 = vcmp.lt.s32.totalorder %v568_v34, %v572_v1 }
 0x10c   :  { %v586_v40 = vsel %vm585_vm3, %v567_v31, %v571_v36  ;;  %v588_v41 = vsel %vm587_vm4, %v568_v34, %v572_v1  ;;  %vm589_vm5 = vcmp.lt.s32.totalorder %v582_v38, %v573_v3  ;;  %vm591_vm6 = vcmp.lt.s32.totalorder %v584_v33, %v574_v24 }
 0x10d   :  { %v590_v39 = vsel %vm589_vm5, %v582_v38, %v573_v3  ;;  %v592_v29 = vsel %vm591_vm6, %v584_v33, %v574_v24  ;;  %vm593_vm7 = vcmp.lt.s32.totalorder %v586_v40, %v575_v27  ;;  %vm595_vm8 = vcmp.lt.s32.totalorder %v588_v41, %v576_v37 }
 0x10e   :  { %v594_v4 = vsel %vm593_vm7, %v586_v40, %v575_v27  ;;  %v596_v42 = vsel %vm595_vm8, %v588_v41, %v576_v37  ;;  %vm597_vm9 = vcmp.lt.s32.totalorder %v590_v39, %v577_v9  ;;  %vm599_vm10 = vcmp.lt.s32.totalorder %v592_v29, %v578_v28 }
 0x10f   :  { %v598_v43 = vsel %vm597_vm9, %v590_v39, %v577_v9  ;;  %v600_v5 = vsel %vm599_vm10, %v592_v29, %v578_v28  ;;  %vm601_vm11 = vcmp.lt.s32.totalorder %v594_v4, %v579_v61  ;;  %vm603_vm12 = vcmp.lt.s32.totalorder %v596_v42, %v580_v2 }
 0x110   :  { %v602_v44 = vsel %vm601_vm11, %v594_v4, %v579_v61  ;;  %v604_v45 = vsel %vm603_vm12, %v596_v42, %v580_v2  ;;  %vm605_vm13 = vcmp.lt.s32.totalorder %v598_v43, %v600_v5  ;;  %vm621_vm3 = vcmp.lt.f32.partialorder %v1119_v18, %v620_v32 }
 0x111   :  { %v606_v6 = vsel %vm605_vm13, %v598_v43, %v600_v5  ;;  %vm607_vm14 = vcmp.lt.s32.totalorder %v602_v44, %v604_v45 }
 0x112   :  { %v608_v47 = vsel %vm607_vm14, %v602_v44, %v604_v45 }
 0x113   :  { %vm609_vm15 = vcmp.lt.s32.totalorder %v606_v6, %v608_v47 }
 0x114   :  { %v610_v46 = vsel %vm609_vm15, %v606_v6, %v608_v47 }
 0x115   :  { %v611_v15 = vrot.slane %v610_v46, 4 }
 0x117   :  { %vm612_vm0 = vcmp.lt.s32.totalorder %v610_v46, %v611_v15 }
 0x118   :  { %v613_v14 = vsel %vm612_vm0, %v610_v46, %v611_v15 }
 0x119   :  { %v614_v48 = vrot.slane %v613_v14, 2 }
 0x11b   :  { %vm615_vm1 = vcmp.lt.s32.totalorder %v613_v14, %v614_v48 }
 0x11c   :  { %v616_v49 = vsel %vm615_vm1, %v613_v14, %v614_v48 }
 0x11d   :  { %v617_v50 = vrot.slane %v616_v49, 1 }
 0x11f   :  { %vm618_vm2 = vcmp.lt.s32.totalorder %v616_v49, %v617_v50 }
 0x120   :  { %v619_v52 = vsel %vm618_vm2, %v616_v49, %v617_v50 }
 0x121   :  { %v623_v53 = vsel %vm621_vm3, %v619_v52, %v622_v51 }
 0x122   :  { %624 = vst [vmem:[#allocation3] sm:$0x1] %v623_v53 }
 0x129   :  { %v631_v54 = vld [vmem:[#allocation3] sm:$0x1] }
 0x12a   :  { %632 = vst [vmem:[#allocation4] sm:$0x1] %v631_v54 }
 0x12b   :  { %726 = shalt.err (!%p723_p4)
}
 0x12c   :  { %s727_s23 = scalar_lea.hbm %s1221_s6, 16 }
 0x12d   :  { %p728_p5 = scmp.ne.s32.totalorder %s1221_s6, %s727_s23  ;;  %p731_p6 = scmp.lt.u32.totalorder %s727_s23, %s1221_s6 }
 0x12f   :  { %p733_p7 = pnand %p731_p6, %p728_p5 }
 0x131   :  { %736 = shalt.err (!%p733_p7)
}
 0x132   :  { %642 = dma.vmem_to_hbm [thread:$0]  %s640_s5, 16, %s1221_s6, [#allocation5]  }
 0x133   :  { %737 = dma.done.wait [#allocation5], 16  }
 0x134   :  { %738 = vsyncadd [#allocation5], 4294967280 }
 0x135   :  { %646 = vsyncpa [#allocation5], 1 }

</bundles_post_ra>
